<compile_context>
chip_gen: v5e
topology: v5e:2x2
jax: 0.10.0
libtpu: 0.0.40
codegen_flags: <defaults>
</compile_context>

<pallas_src>
import functools

import jax
import jax.numpy as jnp
from jax.experimental import pallas as pl
from jax.experimental.pallas import tpu as pltpu


def _round_up(x, m):
    return (x + m - 1) // m * m


def _djb_train_kernel(x_ref, w_ref, b_ref, mask_ref, out_ref, *, tn):
    """x:(TM,H_in)  w:(H_in,2*TN)=[W1_tile|W2_tile]  b:(1,2*TN)  mask:(TM,TN)."""
    y = (jnp.dot(x_ref[...], w_ref[...], preferred_element_type=jnp.float32)
         + b_ref[...])
    out = y[:, :tn]          # layer(x) tile
    backup = y[:, tn:]       # backup(x) tile
    # mask==1 -> keep layer output, mask==0 -> take backup output.
    out_ref[...] = jnp.where(mask_ref[...] != 0.0, out, backup).astype(out_ref.dtype)


def _djb_eval_kernel(x_ref, w_ref, b_ref, out_ref):
    """Eval / not-saved path: plain layer(x)."""
    out_ref[...] = (jnp.dot(x_ref[...], w_ref[...],
                            preferred_element_type=jnp.float32)
                    + b_ref[...]).astype(out_ref.dtype)


def djb_forward(x, params, *, p, key, training, is_save, tm=256, tn=256):
    """x: [N, H_in] float32.

    params = (w1_t, b1, w2_t, b2) with w*_t: [H_in, H_out] (pre-transposed
    PyTorch Linear weights), b*: [H_out].
    """
    w1_t, b1, w2_t, b2 = params
    N, H_in = x.shape
    H_out = w1_t.shape[1]

    # ---- tile sizing / lane-dense padding -----------------------------------
    H_pad = _round_up(H_out, 128)          # lane-dense output dim
    tn = min(tn, H_pad)
    while H_pad % tn:                      # pick a TN (multiple of 128) dividing H_pad
        tn //= 2
    tm = min(tm, _round_up(N, 8))          # token tile (sublane multiple of 8)
    N_pad = _round_up(N, tm)

    x_p = jnp.pad(x, ((0, N_pad - N), (0, 0)))

    def pad_w(w):
        return jnp.pad(w, ((0, 0), (0, H_pad - H_out)))

    def pad_b(b):
        return jnp.pad(b.reshape(1, -1), ((0, 0), (0, H_pad - H_out)))

    w1p, w2p = pad_w(w1_t), pad_w(w2_t)
    b1p, b2p = pad_b(b1), pad_b(b2)

    n_j = H_pad // tn
    n_i = N_pad // tm
    grid = (n_j, n_i)                       # feature axis outer -> weights resident
    out_shape = jax.ShapeDtypeStruct((N_pad, H_pad), x.dtype)
    out_spec = pl.BlockSpec((tm, tn), lambda j, i: (i, j))
    x_spec = pl.BlockSpec((tm, H_in), lambda j, i: (i, 0))
    cparams = pltpu.CompilerParams(dimension_semantics=("parallel", "parallel"))

    if training and is_save:
        # Interleave W1/W2 (and biases) at TN granularity:
        #   fused cols = [W1_tile0 | W2_tile0 | W1_tile1 | W2_tile1 | ...]
        # so one (H_in, 2*TN) block per j covers both layers -> single MXU pass.
        w_f = jnp.concatenate(
            [w1p.reshape(H_in, n_j, 1, tn), w2p.reshape(H_in, n_j, 1, tn)],
            axis=2).reshape(H_in, 2 * H_pad)
        b_f = jnp.concatenate(
            [b1p.reshape(1, n_j, 1, tn), b2p.reshape(1, n_j, 1, tn)],
            axis=2).reshape(1, 2 * H_pad)

        # Binary {0,1} keep-mask with P(1) = 1 - p  (== F.dropout(ones,p)*(1-p)).
        # TODO(synk): mask uses JAX host-side RNG; not bit-identical to torch's
        # dropout stream (distributionally equivalent).
        keep = jax.random.bernoulli(key, 1.0 - p, (N_pad, H_pad)).astype(x.dtype)

        itemsize = jnp.dtype(x.dtype).itemsize
        cost = pl.CostEstimate(
            flops=2 * N_pad * H_in * 2 * H_pad,
            transcendentals=0,
            bytes_accessed=itemsize * (N_pad * H_in                 # x
                                       + H_in * 2 * H_pad + 2 * H_pad  # W, b
                                       + 2 * N_pad * H_pad))        # mask + out

        out_pad = pl.pallas_call(
            functools.partial(_djb_train_kernel, tn=tn),
            out_shape=out_shape,
            grid=grid,
            in_specs=[
                x_spec,
                pl.BlockSpec((H_in, 2 * tn), lambda j, i: (0, j)),
                pl.BlockSpec((1, 2 * tn), lambda j, i: (0, j)),
                pl.BlockSpec((tm, tn), lambda j, i: (i, j)),
            ],
            out_specs=out_spec,
            compiler_params=cparams,
            cost_estimate=cost,
        )(x_p, w_f, b_f, keep)
    else:
        itemsize = jnp.dtype(x.dtype).itemsize
        cost = pl.CostEstimate(
            flops=2 * N_pad * H_in * H_pad,
            transcendentals=0,
            bytes_accessed=itemsize * (N_pad * H_in + H_in * H_pad + H_pad
                                       + N_pad * H_pad))

        out_pad = pl.pallas_call(
            _djb_eval_kernel,
            out_shape=out_shape,
            grid=grid,
            in_specs=[
                x_spec,
                pl.BlockSpec((H_in, tn), lambda j, i: (0, j)),
                pl.BlockSpec((1, tn), lambda j, i: (0, j)),
            ],
            out_specs=out_spec,
            compiler_params=cparams,
            cost_estimate=cost,
        )(x_p, w1p, b1p)

    return out_pad[:N, :H_out]


if __name__ == "__main__":
    # Small shapes: batch=2, seq=8, hidden_in=32, hidden_out=32.
    B, S, H_IN, H_OUT = 2, 8, 32, 32
    P_DJB = 0.3

    key = jax.random.PRNGKey(0)
    kx, kw1, kb1, kw2, kb2, kmask = jax.random.split(key, 6)

    x = jax.random.normal(kx, (B, S, H_IN), dtype=jnp.float32)
    x2d = x.reshape(B * S, H_IN)                     # glue: flatten tokens

    # PyTorch Linear weight shape is (out, in); pre-transpose to (in, out).
    w1 = jax.random.normal(kw1, (H_OUT, H_IN), dtype=jnp.float32) * 0.1
    b1 = jax.random.normal(kb1, (H_OUT,), dtype=jnp.float32) * 0.1
    # "backup" layer (deepcopy in PyTorch); distinct params so blending is exercised.
    w2 = jax.random.normal(kw2, (H_OUT, H_IN), dtype=jnp.float32) * 0.1
    b2 = jax.random.normal(kb2, (H_OUT,), dtype=jnp.float32) * 0.1

    params = (w1.T, b1, w2.T, b2)

    # Training + is_save path (the DJB blend).
    out_train = djb_forward(x2d, params, p=P_DJB, key=kmask,
                            training=True, is_save=True)
    out_train = jax.block_until_ready(out_train).reshape(B, S, H_OUT)

    # Eval path (plain layer output).
    out_eval = djb_forward(x2d, params, p=P_DJB, key=kmask,
                           training=False, is_save=False)
    out_eval = jax.block_until_ready(out_eval).reshape(B, S, H_OUT)

    # Sanity checks against pure-JAX references.
    ref_out = x @ w1.T + b1
    ref_backup = x @ w2.T + b2
    assert jnp.allclose(out_eval, ref_out, atol=1e-5), "eval path mismatch"
    # Every blended element must equal either layer-out or backup-out.
    close_a = jnp.isclose(out_train, ref_out, atol=1e-5)
    close_b = jnp.isclose(out_train, ref_backup, atol=1e-5)
    assert bool(jnp.all(close_a | close_b)), "blend path produced foreign values"

    print("KERNEL_OK")
</pallas_src>

<mosaic_0001>
module attributes {stable_mosaic.version = 11 : i64} {
  func.func @_djb_train_kernel(%arg0: i32, %arg1: i32, %arg2: memref<16x32xf32, #tpu.memory_space<vmem>>, %arg3: memref<32x256xf32, #tpu.memory_space<vmem>>, %arg4: memref<1x256xf32, #tpu.memory_space<vmem>>, %arg5: memref<16x128xf32, #tpu.memory_space<vmem>>, %arg6: memref<16x128xf32, #tpu.memory_space<vmem>>) attributes {dimension_semantics = [#tpu.dimension_semantics<parallel>, #tpu.dimension_semantics<parallel>], iteration_bounds = array<i64: 1, 1>, scalar_prefetch = 0 : i64, scratch_operands = 0 : i64, tpu.core_type = #tpu.core_type<tc>, window_params = [{transform_indices = @transform_0, window_bounds = array<i64: 16, 32>}, {transform_indices = @transform_1, window_bounds = array<i64: 32, 256>}, {transform_indices = @transform_2, window_bounds = array<i64: 1, 256>}, {transform_indices = @transform_3, window_bounds = array<i64: 16, 128>}, {transform_indices = @transform_4, window_bounds = array<i64: 16, 128>}]} {
    %c0 = arith.constant 0 : index
    %c0_0 = arith.constant 0 : index
    %0 = vector.load %arg2[%c0, %c0_0] : memref<16x32xf32, #tpu.memory_space<vmem>>, vector<16x32xf32>
    %c0_1 = arith.constant 0 : index
    %c0_2 = arith.constant 0 : index
    %1 = vector.load %arg3[%c0_1, %c0_2] : memref<32x256xf32, #tpu.memory_space<vmem>>, vector<32x256xf32>
    %cst = arith.constant dense<0.000000e+00> : vector<16x256xf32>
    %2 = tpu.matmul %0, %1, %cst {dimension_numbers = #tpu.dot_dimension_numbers<[1], [0], [0], [1], [0, 0, 1, 1], [], []>} : vector<16x32xf32>, vector<32x256xf32>, vector<16x256xf32> -> vector<16x256xf32>
    %c0_3 = arith.constant 0 : index
    %c0_4 = arith.constant 0 : index
    %3 = vector.load %arg4[%c0_3, %c0_4] : memref<1x256xf32, #tpu.memory_space<vmem>>, vector<1x256xf32>
    %4 = vector.broadcast %3 : vector<1x256xf32> to vector<16x256xf32>
    %5 = arith.addf %2, %4 : vector<16x256xf32>
    %6 = vector.extract_strided_slice %5 {offsets = [0, 0], sizes = [16, 128], strides = [1, 1]} : vector<16x256xf32> to vector<16x128xf32>
    %7 = vector.extract_strided_slice %5 {offsets = [0, 128], sizes = [16, 128], strides = [1, 1]} : vector<16x256xf32> to vector<16x128xf32>
    %c0_5 = arith.constant 0 : index
    %c0_6 = arith.constant 0 : index
    %8 = vector.load %arg5[%c0_5, %c0_6] : memref<16x128xf32, #tpu.memory_space<vmem>>, vector<16x128xf32>
    %cst_7 = arith.constant 0.000000e+00 : f32
    %9 = vector.broadcast %cst_7 : f32 to vector<16x128xf32>
    %10 = arith.cmpf one, %8, %9 : vector<16x128xf32>
    %11 = arith.select %10, %6, %7 : vector<16x128xi1>, vector<16x128xf32>
    %c0_8 = arith.constant 0 : index
    %c0_9 = arith.constant 0 : index
    %12 = vector.load %arg6[%c0_8, %c0_9] : memref<16x128xf32, #tpu.memory_space<vmem>>, vector<16x128xf32>
    tpu.vector_store %arg6[%c0_8, %c0_9], %11 {strides = array<i32>} : memref<16x128xf32, #tpu.memory_space<vmem>>, vector<16x128xf32>,
    return
  }
  func.func @transform_0(%arg0: i32, %arg1: i32) -> (i32, i32) {
    %c0_i32 = arith.constant 0 : i32
    %c0_i32_0 = arith.constant 0 : i32
    return %arg1, %c0_i32 : i32, i32
  }
  func.func @transform_1(%arg0: i32, %arg1: i32) -> (i32, i32) {
    %c0_i32 = arith.constant 0 : i32
    %c0_i32_0 = arith.constant 0 : i32
    return %c0_i32, %arg0 : i32, i32
  }
  func.func @transform_2(%arg0: i32, %arg1: i32) -> (i32, i32) {
    %c0_i32 = arith.constant 0 : i32
    %c0_i32_0 = arith.constant 0 : i32
    return %c0_i32, %arg0 : i32, i32
  }
  func.func @transform_3(%arg0: i32, %arg1: i32) -> (i32, i32) {
    %c0_i32 = arith.constant 0 : i32
    return %arg1, %arg0 : i32, i32
  }
  func.func @transform_4(%arg0: i32, %arg1: i32) -> (i32, i32) {
    %c0_i32 = arith.constant 0 : i32
    return %arg1, %arg0 : i32, i32
  }
}

</mosaic_0001>

<bundles_post_ra>
// kernel: tpu_custom_call.1
= control target key start
LH: loop header
LB: loop body
LE: loop exit
PB: predicated region body
PF: predicated region fallthrough
CT: control target
= control target key end

     0   :  { %9 = vsyncpa [#allocation3], 0  ;;  %s384_s0 = inlined_call_operand.hbm [shape: f32[16,32], index: 0, kind: input, shape index: {}]   ;;  %s385_s1 = inlined_call_operand.hbm [shape: f32[32,256], index: 1, kind: input, shape index: {}]   ;;  %s386_s2 = inlined_call_operand.hbm [shape: f32[1,256], index: 2, kind: input, shape index: {}]   ;;  %s387_s3 = inlined_call_operand.hbm [shape: f32[16,128], index: 3, kind: input, shape index: {}]   ;;  %s388_s4 = inlined_call_operand.hbm [shape: f32[16,128], index: 4, kind: output, shape index: {}]  }
   0x1   :  { %10 = vsyncpa [#allocation6], 0 }
   0x2   :  { %11 = vsyncpa [#allocation9], 0  ;;  %s30_s17 = sshll.u32 %s385_s1, 4  ;;  %s31_s17 = int_to_ptr.hbm [resolvable:$true] %s30_s17 }
   0x3   :  { %12 = vsyncpa [#allocation4], 0  ;;  %s326_s18 = smov [#allocation5]   ;;  %s17_s22 = sshll.u32 %s384_s0, 4  ;;  %s18_s22 = int_to_ptr.hbm [resolvable:$true] %s17_s22 }
   0x4   :  { %s32_s19 = sshll.u32 %s326_s18, 4  ;;  %s327_s23 = smov 256   ;;  %s33_s19 = int_to_ptr.vmem [resolvable:$true] %s32_s19 }
   0x5   :  { %s328_s24 = smov 16   ;;  %s329_s25 = smov [#allocation2]  }
   0x6   :  { %38 = dma.hbm_to_vmem [thread:$0]  %s31_s17, 1024, %s33_s19, [#allocation6], %s327_s23, %s327_s23, %s328_s24  }
   0x7   :  { %s19_s26 = sshll.u32 %s329_s25, 4  ;;  %s330_s27 = smov 128   ;;  %s20_s26 = int_to_ptr.vmem [resolvable:$true] %s19_s26 }
   0x8   :  { %s331_s28 = smov 8   ;;  %s44_s30 = sshll.u32 %s386_s2, 4  ;;  %s45_s30 = int_to_ptr.hbm [resolvable:$true] %s44_s30 }
   0x9   :  { %25 = dma.hbm_to_vmem [thread:$0]  %s18_s22, 256, %s20_s26, [#allocation3], %s330_s27, %s330_s27, %s331_s28  }
   0xa   :  { %s332_s5 = smov [#allocation7]   ;;  %s54_s8 = sshll.u32 %s387_s3, 4  ;;  %s55_s8 = int_to_ptr.hbm [resolvable:$true] %s54_s8 }
   0xb   :  { %s46_s0 = sshll.u32 %s332_s5, 4  ;;  %s333_s9 = smov [#allocation8]   ;;  %s47_s0 = int_to_ptr.vmem [resolvable:$true] %s46_s0 }
   0xc   :  { %49 = dma.hbm_to_vmem [thread:$0]  %s45_s30, 32, %s47_s0, [#allocation6]  }
   0xd   :  { %s56_s10 = sshll.u32 %s333_s9, 4  ;;  %s57_s10 = int_to_ptr.vmem [resolvable:$true] %s56_s10 }
   0xe   :  { %62 = dma.hbm_to_vmem [thread:$0]  %s55_s8, 256, %s57_s10, [#allocation9], %s330_s27, %s330_s27, %s331_s28  }
   0xf   :  { %318 = dma.done.wait [#allocation3], 256  }
  0x10   :  { %319 = vsyncadd [#allocation3], 4294967040 }
  0x11   :  { %320 = dma.done.wait [#allocation6], 1056  }
  0x12   :  { %321 = vsyncadd [#allocation6], 4294966240 }
  0x13   :  { %322 = dma.done.wait [#allocation9], 256  }
  0x14   :  { %323 = vsyncadd [#allocation9], 4294967040  ;;  %v87_v0 = vld [vmem:[#allocation5 + $0x30] sm:$0xff]  ;;  %v88_v1 = vld [vmem:[#allocation5 + $0x38] sm:$0xff]  ;;  %vm95_vm0 = vcmask 261120   ;;  %s334_s2 = smov [#allocation10]  }
  0x15   :  { %v85_v2 = vld [vmem:[#allocation5 + $0x20] sm:$0xff]  ;;  %181 = vmatpush.msra.mxu2 %v87_v0  ;;  %185 = vmatpush.msra.mxu3 %v88_v1  ;;  %v86_v3 = vld [vmem:[#allocation5 + $0x28] sm:$0xff]  ;;  %v83_v4 = vld [vmem:[#allocation5 + $0x10] sm:$0xff]  ;;  %s160_s3 = sshll.u32 %s334_s2, 4  ;;  %s162_s13 = sshll.u32 %s388_s4, 4  ;;  %s161_s3 = int_to_ptr.vmem [resolvable:$true] %s160_s3  ;;  %s163_s13 = int_to_ptr.hbm [resolvable:$true] %s162_s13 }
  0x16   :  { %v84_v5 = vld [vmem:[#allocation5 + $0x18] sm:$0xff]  ;;  %114 = vmatpush.msra.mxu0 %v87_v0  ;;  %137 = vmatpush.msra.mxu1 %v88_v1  ;;  %v81_v6 = vld [vmem:[#allocation5] sm:$0xff]  ;;  %v82_v7 = vld [vmem:[#allocation5 + $0x8] sm:$0xff] }
  0x17   :  { %182 = vmatpush.msra.mxu2 %v85_v2  ;;  %186 = vmatpush.msra.mxu3 %v86_v3  ;;  %v80_v8 = vld [vmem:[#allocation2 + $0x8] sm:$0xff]  ;;  %v79_v9 = vld [vmem:[#allocation2] sm:$0xff]  ;;  %v89_v10 = vld [vmem:[#allocation7] sm:$0x3] }
  0x18   :  { %115 = vmatpush.msra.mxu0 %v85_v2  ;;  %138 = vmatpush.msra.mxu1 %v86_v3  ;;  %v91_v11 = vperm.slane %v89_v10, 0  ;;  %v92_v12 = vperm.slane %v89_v10, 1  ;;  %v148_v13 = vld [vmem:[#allocation8] sm:$0xff]  ;;  %v149_v18 = vld [vmem:[#allocation8 + $0x8] sm:$0xff] }
  0x19   :  { %183 = vmatpush.msra.mxu2 %v83_v4  ;;  %187 = vmatpush.msra.mxu3 %v84_v5  ;;  %vm150_vm1 = vcmp.ne.f32.partialorder %v148_v13, 0.0  ;;  %vm151_vm2 = vcmp.ne.f32.partialorder %v149_v18, 0.0 }
  0x1a   :  { %116 = vmatpush.msra.mxu0 %v83_v4  ;;  %139 = vmatpush.msra.mxu1 %v84_v5 }
  0x1b   :  { %184 = vmatpush.msra.mxu2 %v81_v6  ;;  %188 = vmatpush.msra.mxu3 %v82_v7 }
  0x1c   :  { %178 = vmatmul.msk.f32.vlgmr.msra.gmra.mxu2 %vm95_vm0, %v80_v8  ;;  %180 = vmatmul.msk.f32.vlgmr.msra.gmra.mxu3 %vm95_vm0, %v80_v8 }
  0x1d   :  { %117 = vmatpush.msra.mxu0 %v81_v6  ;;  %140 = vmatpush.msra.mxu1 %v82_v7 }
  0x1e   :  { %177 = vmatmul.msk.f32.vlgmr.msra.gmra.mxu0 %vm95_vm0, %v79_v9  ;;  %179 = vmatmul.msk.f32.vlgmr.msra.gmra.mxu1 %vm95_vm0, %v79_v9 }
  0x9b   :  { %v119_v14 = vpop.f32.mrf.mxu0  ;;  %v142_v15 = vpop.f32.mrf.mxu1 }
  0x9c   :  { %v120_v16 = vadd.f32 %v119_v14, %v91_v11  ;;  %v143_v17 = vadd.f32 %v142_v15, %v92_v12 }
  0x9e   :  { %v152_v19 = vsel %vm150_vm1, %v120_v16, %v143_v17 }
  0x9f   :  { %v122_v20 = vpop.f32.mrf.mxu2  ;;  %154 = vst [vmem:[#allocation10] sm:$0xff] %v152_v19  ;;  %v145_v21 = vpop.f32.mrf.mxu3 }
  0xa0   :  { %v123_v22 = vadd.f32 %v122_v20, %v91_v11  ;;  %v146_v23 = vadd.f32 %v145_v21, %v92_v12 }
  0xa2   :  { %v153_v24 = vsel %vm151_vm2, %v123_v22, %v146_v23 }
  0xa3   :  { %155 = vst [vmem:[#allocation10 + $0x8] sm:$0xff] %v153_v24 }
  0xa4   :  { %168 = dma.vmem_to_hbm [thread:$0]  %s161_s3, 256, %s163_s13, [#allocation4], %s330_s27, %s330_s27, %s331_s28  }
  0xa5   :  { %324 = dma.done.wait [#allocation4], 256  }
  0xa6   :  { %325 = vsyncadd [#allocation4], 4294967040 }
  0xa7   :  { %173 = vsyncpa [#allocation3], 1 }
  0xa8   :  { %174 = vsyncpa [#allocation6], 1 }
  0xa9   :  { %175 = vsyncpa [#allocation9], 1 }
  0xaa   :  { %176 = vsyncpa [#allocation4], 1 }

</bundles_post_ra>
